<compile_context>
chip_gen: v7x
topology: tpu7x:2x2x1
jax: 0.10.0
libtpu: 0.0.40
codegen_flags: <defaults>
</compile_context>

<pallas_src>
import jax
import jax.numpy as jnp
from jax.experimental import pallas as pl
from jax.experimental.pallas import tpu as pltpu  # noqa: F401  (TPU backend)

LANE = 128


def _round_up(n, m):
    return ((n + m - 1) // m) * m


# ----------------------------- fused MLP kernel -----------------------------

def _mlp_fused_kernel(x_ref, w1_ref, b1_ref, w2_ref, b2_ref, w3_ref, b3_ref,
                      o_ref):
    """o = (relu(relu(x@W1+b1)@W2+b2))@W3 + b3, all resident in VMEM/vregs.

    x:(B,K)  W1:(K,H1) b1:(1,H1)  W2:(H1,H2) b2:(1,H2)  W3:(H2,Np) b3:(1,Np)
    o:(B,Np) with Np = num_classes padded to a multiple of 128 (lane-dense).
    """
    h = jnp.dot(x_ref[...], w1_ref[...], preferred_element_type=jnp.float32)
    h = jnp.maximum(h + b1_ref[...], 0.0)
    h = jnp.dot(h, w2_ref[...], preferred_element_type=jnp.float32)
    h = jnp.maximum(h + b2_ref[...], 0.0)
    h = jnp.dot(h, w3_ref[...], preferred_element_type=jnp.float32)
    o_ref[...] = (h + b3_ref[...]).astype(o_ref.dtype)


def mlp_forward(x, params):
    """Matches PyTorch:  out = x.view(x.size(0), -1); out = linear(out)."""
    B = x.shape[0]
    xf = x.reshape(B, -1).astype(jnp.float32)          # x.view(x.size(0), -1)

    w1, b1 = params["fc1_w"], params["fc1_b"]           # (K,256), (256,)
    w2, b2 = params["fc2_w"], params["fc2_b"]           # (256,64), (64,)
    w3, b3 = params["fc3_w"], params["fc3_b"]           # (64,C),  (C,)

    K = xf.shape[1]
    H1 = w1.shape[1]
    H2 = w2.shape[1]
    C = w3.shape[1]

    # Lane-dense final output: pad num_classes -> multiple of 128 with zeros.
    Cp = _round_up(C, LANE)
    w3p = jnp.pad(w3, ((0, 0), (0, Cp - C)))
    b3p = jnp.pad(b3, (0, Cp - C))

    out = pl.pallas_call(
        _mlp_fused_kernel,
        out_shape=jax.ShapeDtypeStruct((B, Cp), jnp.float32),
        in_specs=[
            pl.BlockSpec((B, K), lambda: (0, 0)),      # x
            pl.BlockSpec((K, H1), lambda: (0, 0)),     # W1
            pl.BlockSpec((1, H1), lambda: (0, 0)),     # b1
            pl.BlockSpec((H1, H2), lambda: (0, 0)),    # W2
            pl.BlockSpec((1, H2), lambda: (0, 0)),     # b2
            pl.BlockSpec((H2, Cp), lambda: (0, 0)),    # W3 (lane-padded)
            pl.BlockSpec((1, Cp), lambda: (0, 0)),     # b3 (lane-padded)
        ],
        out_specs=pl.BlockSpec((B, Cp), lambda: (0, 0)),
    )(xf, w1, b1.reshape(1, H1), w2, b2.reshape(1, H2), w3p,
      b3p.reshape(1, Cp))

    return out[:, :C]                                   # (B, num_classes)


# ----------------------------- parameter init -----------------------------

def init_params(key, in_size=28 * 28 * 1, num_classes=10):
    """PyTorch nn.Linear default init: U(-1/sqrt(fan_in), 1/sqrt(fan_in))."""
    ks = jax.random.split(key, 6)

    def lin_init(kw, kb, fin, fout):
        bound = 1.0 / jnp.sqrt(jnp.float32(fin))
        w = jax.random.uniform(kw, (fin, fout), jnp.float32, -bound, bound)
        b = jax.random.uniform(kb, (fout,), jnp.float32, -bound, bound)
        return w, b

    fc1_w, fc1_b = lin_init(ks[0], ks[1], in_size, 256)
    fc2_w, fc2_b = lin_init(ks[2], ks[3], 256, 64)
    fc3_w, fc3_b = lin_init(ks[4], ks[5], 64, num_classes)
    return dict(fc1_w=fc1_w, fc1_b=fc1_b,
                fc2_w=fc2_w, fc2_b=fc2_b,
                fc3_w=fc3_w, fc3_b=fc3_b)


if __name__ == "__main__":
    key = jax.random.PRNGKey(0)
    k_params, k_x = jax.random.split(key)

    in_size = 28 * 28 * 1
    num_classes = 10
    params = init_params(k_params, in_size=in_size, num_classes=num_classes)

    # Same shape the PyTorch module implies: (B, 1, 28, 28) -> flattened to 784.
    x = jax.random.normal(k_x, (2, 1, 28, 28), jnp.float32)

    fwd = jax.jit(mlp_forward)
    y = fwd(x, params)
    jax.block_until_ready(y)

    assert y.shape == (2, num_classes), y.shape
    assert bool(jnp.all(jnp.isfinite(y)))

    # Reference check against plain-JAX (XLA) forward.
    xf = x.reshape(2, -1)
    ref = jnp.maximum(xf @ params["fc1_w"] + params["fc1_b"], 0.0)
    ref = jnp.maximum(ref @ params["fc2_w"] + params["fc2_b"], 0.0)
    ref = ref @ params["fc3_w"] + params["fc3_b"]
    assert bool(jnp.allclose(y, ref, atol=1e-4, rtol=1e-4))

    print("KERNEL_OK")
</pallas_src>

<mosaic_0001>
module attributes {stable_mosaic.version = 11 : i64} {
  func.func @_mlp_fused_kernel(%arg0: memref<2x784xf32, #tpu.memory_space<vmem>>, %arg1: memref<784x256xf32, #tpu.memory_space<vmem>>, %arg2: memref<1x256xf32, #tpu.memory_space<vmem>>, %arg3: memref<256x64xf32, #tpu.memory_space<vmem>>, %arg4: memref<1x64xf32, #tpu.memory_space<vmem>>, %arg5: memref<64x128xf32, #tpu.memory_space<vmem>>, %arg6: memref<1x128xf32, #tpu.memory_space<vmem>>, %arg7: memref<2x128xf32, #tpu.memory_space<vmem>>) attributes {dimension_semantics = [], scalar_prefetch = 0 : i64, scratch_operands = 0 : i64, tpu.core_type = #tpu.core_type<tc>} {
    %c0 = arith.constant 0 : index
    %c0_0 = arith.constant 0 : index
    %0 = vector.load %arg0[%c0, %c0_0] : memref<2x784xf32, #tpu.memory_space<vmem>>, vector<2x784xf32>
    %c0_1 = arith.constant 0 : index
    %c0_2 = arith.constant 0 : index
    %1 = vector.load %arg1[%c0_1, %c0_2] : memref<784x256xf32, #tpu.memory_space<vmem>>, vector<784x256xf32>
    %cst = arith.constant dense<0.000000e+00> : vector<2x256xf32>
    %2 = tpu.matmul %0, %1, %cst {dimension_numbers = #tpu.dot_dimension_numbers<[1], [0], [0], [1], [0, 0, 1, 1], [], []>} : vector<2x784xf32>, vector<784x256xf32>, vector<2x256xf32> -> vector<2x256xf32>
    %c0_3 = arith.constant 0 : index
    %c0_4 = arith.constant 0 : index
    %3 = vector.load %arg2[%c0_3, %c0_4] : memref<1x256xf32, #tpu.memory_space<vmem>>, vector<1x256xf32>
    %4 = vector.broadcast %3 : vector<1x256xf32> to vector<2x256xf32>
    %5 = arith.addf %2, %4 : vector<2x256xf32>
    %cst_5 = arith.constant 0.000000e+00 : f32
    %6 = vector.broadcast %cst_5 : f32 to vector<2x256xf32>
    %7 = arith.maximumf %5, %6 : vector<2x256xf32>
    %c0_6 = arith.constant 0 : index
    %c0_7 = arith.constant 0 : index
    %8 = vector.load %arg3[%c0_6, %c0_7] : memref<256x64xf32, #tpu.memory_space<vmem>>, vector<256x64xf32>
    %cst_8 = arith.constant dense<0.000000e+00> : vector<2x64xf32>
    %9 = tpu.matmul %7, %8, %cst_8 {dimension_numbers = #tpu.dot_dimension_numbers<[1], [0], [0], [1], [0, 0, 1, 1], [], []>} : vector<2x256xf32>, vector<256x64xf32>, vector<2x64xf32> -> vector<2x64xf32>
    %c0_9 = arith.constant 0 : index
    %c0_10 = arith.constant 0 : index
    %10 = vector.load %arg4[%c0_9, %c0_10] : memref<1x64xf32, #tpu.memory_space<vmem>>, vector<1x64xf32>
    %11 = vector.broadcast %10 : vector<1x64xf32> to vector<2x64xf32>
    %12 = arith.addf %9, %11 : vector<2x64xf32>
    %cst_11 = arith.constant 0.000000e+00 : f32
    %13 = vector.broadcast %cst_11 : f32 to vector<2x64xf32>
    %14 = arith.maximumf %12, %13 : vector<2x64xf32>
    %c0_12 = arith.constant 0 : index
    %c0_13 = arith.constant 0 : index
    %15 = vector.load %arg5[%c0_12, %c0_13] : memref<64x128xf32, #tpu.memory_space<vmem>>, vector<64x128xf32>
    %cst_14 = arith.constant dense<0.000000e+00> : vector<2x128xf32>
    %16 = tpu.matmul %14, %15, %cst_14 {dimension_numbers = #tpu.dot_dimension_numbers<[1], [0], [0], [1], [0, 0, 1, 1], [], []>} : vector<2x64xf32>, vector<64x128xf32>, vector<2x128xf32> -> vector<2x128xf32>
    %c0_15 = arith.constant 0 : index
    %c0_16 = arith.constant 0 : index
    %17 = vector.load %arg6[%c0_15, %c0_16] : memref<1x128xf32, #tpu.memory_space<vmem>>, vector<1x128xf32>
    %18 = vector.broadcast %17 : vector<1x128xf32> to vector<2x128xf32>
    %19 = arith.addf %16, %18 : vector<2x128xf32>
    %c0_17 = arith.constant 0 : index
    %c0_18 = arith.constant 0 : index
    %20 = vector.load %arg7[%c0_17, %c0_18] : memref<2x128xf32, #tpu.memory_space<vmem>>, vector<2x128xf32>
    tpu.vector_store %arg7[%c0_17, %c0_18], %19 {strides = array<i32>} : memref<2x128xf32, #tpu.memory_space<vmem>>, vector<2x128xf32>,
    return
  }
}

</mosaic_0001>

<bundles_post_ra>
// kernel: mlp_forward.1
= control target key start
LH: loop header
LB: loop body
LE: loop exit
PB: predicated region body
PF: predicated region fallthrough
CT: control target
= control target key end

     0   :  { %12 = vsyncpa [#allocation3], 0  ;;  %s1409_s0 = inlined_call_operand.vmem [shape: f32[2,784], index: 0, kind: input, shape index: {}]   ;;  %s1410_s1 = inlined_call_operand.hbm [shape: f32[784,256], index: 1, kind: input, shape index: {}]   ;;  %s1411_s2 = inlined_call_operand.vmem [shape: f32[1,256], index: 2, kind: input, shape index: {}]   ;;  %s1412_s3 = inlined_call_operand.vmem [shape: f32[256,64], index: 3, kind: input, shape index: {}]   ;;  %s1413_s4 = inlined_call_operand.vmem [shape: f32[1,64], index: 4, kind: input, shape index: {}]   ;;  %s1414_s5 = inlined_call_operand.vmem [shape: f32[64,128], index: 5, kind: input, shape index: {}]   ;;  %s1415_s6 = inlined_call_operand.vmem [shape: f32[1,128], index: 6, kind: input, shape index: {}]   ;;  %s1416_s7 = inlined_call_operand.hbm [shape: f32[2,128], index: 7, kind: output, shape index: {}]  }
   0x1   :  { %13 = vsyncpa [#allocation4], 0  ;;  %s1169_s24 = smov [#allocation2]   ;;  %s1121_s28 = scalar_lea.hbm %s1410_s1, 25088 }
   0x2   :  { %s21_s25 = sshll.u32 %s1169_s24, 4  ;;  %p1122_p0 = scmp.ne.s32.totalorder %s1410_s1, %s1121_s28  ;;  %s22_s25 = int_to_ptr.vmem [resolvable:$true] %s21_s25 }
   0x3   :  { %p1125_p1 = scmp.lt.u32.totalorder %s1121_s28, %s1410_s1 }
   0x5   :  { %p1127_p2 = pnand %p1125_p1, %p1122_p0 }
   0x7   :  { %1130 = shalt.err (!%p1127_p2)
}
   0x8   :  { %s1131_s10 = scalar_lea.vmem %s22_s25, 25088  ;;  %p1136_p4 = scmp.lt.s32.totalorder %s22_s25, %s22_s25 }
   0x9   :  { %p1132_p3 = scmp.ne.s32.totalorder %s22_s25, %s1131_s10  ;;  %p1137_p5 = scmp.lt.s32.totalorder %s1131_s10, %s1131_s10 }
   0xb   :  { %p1138_p6 = por %p1137_p5, %p1136_p4 }
   0xd   :  { %p1139_p7 = pnand %p1138_p6, %p1132_p3 }
   0xf   :  { %1142 = shalt.err (!%p1139_p7)
}
  0x10   :  { %s1170_s11 = smov 256   ;;  %s1171_s12 = smov 16  }
  0x11   :  { %27 = dma.hbm_to_vmem [thread:$0]  %s1410_s1, 25088, %s22_s25, [#allocation3], %s1170_s11, %s1170_s11, %s1171_s12  }
  0x12   :  { %1165 = dma.done.wait [#allocation3], 25088  }
  0x13   :  { %1166 = vsyncadd [#allocation3], 4294942208  ;;  %v108_v0 = vld [vmem:[#allocation2 + $0x208] sm:$0xff]  ;;  %v110_v1 = vld [vmem:[#allocation2 + $0x218] sm:$0xff]  ;;  %v241_v29 = vlaneseq  ;;  %v1172_v30 = vmov 1983009808  }
  0x14   :  { %v107_v2 = vld [vmem:[#allocation2 + $0x200] sm:$0xff]  ;;  %v927_v3 = vpack.c.bf16 %v110_v1, %v108_v0  ;;  %v109_v4 = vld [vmem:[#allocation2 + $0x210] sm:$0xff]  ;;  %v112_v5 = vld [vmem:[#allocation2 + $0x228] sm:$0xff]  ;;  %v255_v31 = vunpack.c.l.s4 %v1172_v30  ;;  %vm292_vm0 = vcmask 130048   ;;  %vm1175_vm1 = vmmov 0  }
  0x15   :  { %v114_v6 = vld [vmem:[#allocation2 + $0x238] sm:$0xff]  ;;  %v929_v7 = vpack.c.bf16 %v109_v4, %v107_v2  ;;  %v111_v9 = vld [vmem:[#allocation2 + $0x220] sm:$0xff]  ;;  %v113_v10 = vld [vmem:[#allocation2 + $0x230] sm:$0xff]  ;;  %v1229_v38 = vshrl.u32 %v241_v29, 7  ;;  %vm706_vm2 = vcmask 523264  }
  0x16   :  { %v931_v8 = vpack.c.bf16 %v114_v6, %v112_v5  ;;  %v116_v11 = vld [vmem:[#allocation2 + $0x248] sm:$0xff]  ;;  %928 = vmatprep.subr.bf16.mxu0 %v927_v3  ;;  %v118_v12 = vld [vmem:[#allocation2 + $0x258] sm:$0xff]  ;;  %v933_v13 = vpack.c.bf16 %v113_v10, %v111_v9  ;;  %v115_v15 = vld [vmem:[#allocation2 + $0x240] sm:$0xff]  ;;  %v256_v39 = vunpack.c.0.s8 %v255_v31 }
  0x17   :  { %930 = vmatpush1.bf16.msra.mxu0 %v929_v7  ;;  %v935_v14 = vpack.c.bf16 %v118_v12, %v116_v11  ;;  %v117_v16 = vld [vmem:[#allocation2 + $0x250] sm:$0xff]  ;;  %v120_v17 = vld [vmem:[#allocation2 + $0x268] sm:$0xff]  ;;  %v122_v18 = vld [vmem:[#allocation2 + $0x278] sm:$0xff] }
  0x18   :  { %932 = vmatprep.subr.bf16.mxu0 %v931_v8  ;;  %v937_v19 = vpack.c.bf16 %v117_v16, %v115_v15  ;;  %v939_v20 = vpack.c.bf16 %v122_v18, %v120_v17  ;;  %v119_v21 = vld [vmem:[#allocation2 + $0x260] sm:$0xff]  ;;  %v121_v22 = vld [vmem:[#allocation2 + $0x270] sm:$0xff]  ;;  %v124_v23 = vld [vmem:[#allocation2 + $0x288] sm:$0xff]  ;;  %v1232_v50 = vsub.s32 %v256_v39, %v1229_v38 }
  0x19   :  { %v126_v24 = vld [vmem:[#allocation2 + $0x298] sm:$0xff]  ;;  %v941_v25 = vpack.c.bf16 %v121_v22, %v119_v21  ;;  %v123_v27 = vld [vmem:[#allocation2 + $0x280] sm:$0xff]  ;;  %v125_v28 = vld [vmem:[#allocation2 + $0x290] sm:$0xff] }
  0x1a   :  { %v943_v26 = vpack.c.bf16 %v126_v24, %v124_v23  ;;  %v128_v32 = vld [vmem:[#allocation2 + $0x2a8] sm:$0xff]  ;;  %v130_v33 = vld [vmem:[#allocation2 + $0x2b8] sm:$0xff]  ;;  %v945_v34 = vpack.c.bf16 %v125_v28, %v123_v27  ;;  %v127_v36 = vld [vmem:[#allocation2 + $0x2a0] sm:$0xff] }
  0x1b   :  { %934 = vmatpush1.bf16.msra.mxu0 %v933_v13  ;;  %v947_v35 = vpack.c.bf16 %v130_v33, %v128_v32  ;;  %v129_v37 = vld [vmem:[#allocation2 + $0x2b0] sm:$0xff]  ;;  %v132_v40 = vld [vmem:[#allocation2 + $0x2c8] sm:$0xff]  ;;  %v134_v41 = vld [vmem:[#allocation2 + $0x2d8] sm:$0xff] }
  0x1c   :  { %936 = vmatprep.subr.bf16.mxu0 %v935_v14  ;;  %v949_v42 = vpack.c.bf16 %v129_v37, %v127_v36  ;;  %v131_v43 = vld [vmem:[#allocation2 + $0x2c0] sm:$0xff]  ;;  %v133_v44 = vld [vmem:[#allocation2 + $0x2d0] sm:$0xff]  ;;  %v44_v45 = vld [vmem:[#allocation2 + $0x8] sm:$0xff]  ;;  %v951_v46 = vpack.c.bf16 %v134_v41, %v132_v40 }
  0x1d   :  { %v136_v47 = vld [vmem:[#allocation2 + $0x2e8] sm:$0xff]  ;;  %v138_v48 = vld [vmem:[#allocation2 + $0x2f8] sm:$0xff]  ;;  %v43_v52 = vld [vmem:[#allocation2] sm:$0xff]  ;;  %v953_v59 = vpack.c.bf16 %v133_v44, %v131_v43 }
  0x1e   :  { %v46_v49 = vld [vmem:[#allocation2 + $0x18] sm:$0xff]  ;;  %v45_v53 = vld [vmem:[#allocation2 + $0x10] sm:$0xff]  ;;  %v41_v54 = vld [vmem:[%s1409_s0] sm:$0xff]  ;;  %v955_v63 = vpack.c.bf16 %v138_v48, %v136_v47 }
  0x1f   :  { %938 = vmatpush1.bf16.msra.mxu0 %v937_v19  ;;  %v863_v51 = vpack.c.bf16 %v46_v49, %v44_v45  ;;  %v865_v55 = vpack.c.bf16 %v45_v53, %v43_v52  ;;  %v253_v56 = vcombine.high %v41_v54, %v41_v54  ;;  %v48_v57 = vld [vmem:[#allocation2 + $0x28] sm:$0xff]  ;;  %v1238_v58 = vrot.slane %v41_v54, %v1232_v50  ;;  %v135_v60 = vld [vmem:[#allocation2 + $0x2e0] sm:$0xff]  ;;  %v137_v61 = vld [vmem:[#allocation2 + $0x2f0] sm:$0xff] }
  0x20   :  { %940 = vmatprep.subr.bf16.mxu0 %v939_v20  ;;  %v50_v62 = vld [vmem:[#allocation2 + $0x38] sm:$0xff]  ;;  %v140_v0 = vld [vmem:[#allocation2 + $0x308] sm:$0xff]  ;;  %v47_v3 = vld [vmem:[#allocation2 + $0x20] sm:$0xff]  ;;  %v957_v13 = vpack.c.bf16 %v137_v61, %v135_v60 }
  0x21   :  { %864 = vmatprep.subr.bf16.mxu1 %v863_v51  ;;  %v1241_v1 = vrot.slane %v253_v56, %v1232_v50  ;;  %v867_v2 = vpack.c.bf16 %v50_v62, %v48_v57  ;;  %v49_v4 = vld [vmem:[#allocation2 + $0x30] sm:$0xff]  ;;  %v142_v5 = vld [vmem:[#allocation2 + $0x318] sm:$0xff]  ;;  %v52_v7 = vld [vmem:[#allocation2 + $0x48] sm:$0xff]  ;;  %v268_v9 = vcombine.high %v1238_v58, %v1238_v58 }
  0x22   :  { %866 = vmatpush1.bf16.msra.mxu1 %v865_v55  ;;  %v869_v6 = vpack.c.bf16 %v49_v4, %v47_v3  ;;  %v54_v8 = vld [vmem:[#allocation2 + $0x58] sm:$0xff]  ;;  %v51_v12 = vld [vmem:[#allocation2 + $0x40] sm:$0xff]  ;;  %v53_v15 = vld [vmem:[#allocation2 + $0x50] sm:$0xff]  ;;  %v959_v16 = vpack.c.bf16 %v142_v5, %v140_v0 }
  0x23   :  { %942 = vmatpush1.bf16.msra.mxu0 %v941_v25  ;;  %v269_v10 = vcombine.high %v1241_v1, %v1241_v1  ;;  %868 = vmatprep.subr.bf16.mxu1 %v867_v2  ;;  %v871_v11 = vpack.c.bf16 %v54_v8, %v52_v7  ;;  %v139_v14 = vld [vmem:[#allocation2 + $0x300] sm:$0xff]  ;;  %v141_v17 = vld [vmem:[#allocation2 + $0x310] sm:$0xff]  ;;  %v56_v18 = vld [vmem:[#allocation2 + $0x68] sm:$0xff]  ;;  %v873_v22 = vpack.c.bf16 %v53_v15, %v51_v12 }
  0x24   :  { %944 = vmatprep.subr.bf16.mxu0 %v943_v26  ;;  %359 = vmatprep.mubr.f32.mxu1 %v268_v9  ;;  %v58_v19 = vld [vmem:[#allocation2 + $0x78] sm:$0xff]  ;;  %v144_v20 = vld [vmem:[#allocation2 + $0x328] sm:$0xff]  ;;  %v55_v24 = vld [vmem:[#allocation2 + $0x60] sm:$0xff]  ;;  %v961_v26 = vpack.c.bf16 %v141_v17, %v139_v14 }
  0x25   :  { %430 = vmatprep.mubr.f32.mxu0 %v269_v10  ;;  %v146_v21 = vld [vmem:[#allocation2 + $0x338] sm:$0xff]  ;;  %v875_v23 = vpack.c.bf16 %v58_v19, %v56_v18  ;;  %v57_v25 = vld [vmem:[#allocation2 + $0x70] sm:$0xff]  ;;  %v60_v27 = vld [vmem:[#allocation2 + $0x88] sm:$0xff] }
  0x26   :  { %870 = vmatpush1.bf16.msra.mxu1 %v869_v6  ;;  %v62_v28 = vld [vmem:[#allocation2 + $0x98] sm:$0xff]  ;;  %v963_v29 = vpack.c.bf16 %v146_v21, %v144_v20  ;;  %v143_v30 = vld [vmem:[#allocation2 + $0x320] sm:$0xff]  ;;  %v145_v31 = vld [vmem:[#allocation2 + $0x330] sm:$0xff] }
  0x27   :  { %946 = vmatpush1.bf16.msra.mxu0 %v945_v34  ;;  %872 = vmatprep.subr.bf16.mxu1 %v871_v11  ;;  %v148_v32 = vld [vmem:[#allocation2 + $0x348] sm:$0xff]  ;;  %v150_v33 = vld [vmem:[#allocation2 + $0x358] sm:$0xff]  ;;  %v877_v34 = vpack.c.bf16 %v57_v25, %v55_v24  ;;  %v59_v36 = vld [vmem:[#allocation2 + $0x80] sm:$0xff]  ;;  %v965_v39 = vpack.c.bf16 %v145_v31, %v143_v30 }
  0x28   :  { %948 = vmatprep.subr.bf16.mxu0 %v947_v35  ;;  %v879_v35 = vpack.c.bf16 %v62_v28, %v60_v27  ;;  %v61_v37 = vld [vmem:[#allocation2 + $0x90] sm:$0xff]  ;;  %v64_v40 = vld [vmem:[#allocation2 + $0xa8] sm:$0xff]  ;;  %v66_v41 = vld [vmem:[#allocation2 + $0xb8] sm:$0xff] }
  0x29   :  { %v147_v43 = vld [vmem:[#allocation2 + $0x340] sm:$0xff]  ;;  %v149_v44 = vld [vmem:[#allocation2 + $0x350] sm:$0xff]  ;;  %v152_v45 = vld [vmem:[#allocation2 + $0x368] sm:$0xff]  ;;  %v881_v47 = vpack.c.bf16 %v61_v37, %v59_v36  ;;  %v883_v48 = vpack.c.bf16 %v66_v41, %v64_v40 }
  0x2a   :  { %874 = vmatpush1.bf16.msra.mxu1 %v873_v22  ;;  %v63_v49 = vld [vmem:[#allocation2 + $0xa0] sm:$0xff]  ;;  %v65_v51 = vld [vmem:[#allocation2 + $0xb0] sm:$0xff]  ;;  %v969_v52 = vpack.c.bf16 %v149_v44, %v147_v43  ;;  %v68_v53 = vld [vmem:[#allocation2 + $0xc8] sm:$0xff] }
  0x2b   :  { %950 = vmatpush1.bf16.msra.mxu0 %v949_v42  ;;  %876 = vmatprep.subr.bf16.mxu1 %v875_v23  ;;  %v967_v42 = vpack.c.bf16 %v150_v33, %v148_v32  ;;  %v70_v54 = vld [vmem:[#allocation2 + $0xd8] sm:$0xff]  ;;  %v151_v56 = vld [vmem:[#allocation2 + $0x360] sm:$0xff]  ;;  %v153_v57 = vld [vmem:[#allocation2 + $0x370] sm:$0xff]  ;;  %v885_v61 = vpack.c.bf16 %v65_v51, %v63_v49 }
  0x2c   :  { %952 = vmatprep.subr.bf16.mxu0 %v951_v46  ;;  %v154_v46 = vld [vmem:[#allocation2 + $0x378] sm:$0xff]  ;;  %v887_v62 = vpack.c.bf16 %v70_v54, %v68_v53  ;;  %v69_v0 = vld [vmem:[#allocation2 + $0xd0] sm:$0xff]  ;;  %v973_v2 = vpack.c.bf16 %v153_v57, %v151_v56  ;;  %v72_v3 = vld [vmem:[#allocation2 + $0xe8] sm:$0xff] }
  0x2d   :  { %v971_v55 = vpack.c.bf16 %v154_v46, %v152_v45  ;;  %v158_v60 = vld [vmem:[#allocation2 + $0x398] sm:$0xff]  ;;  %v155_v6 = vld [vmem:[#allocation2 + $0x380] sm:$0xff]  ;;  %v157_v7 = vld [vmem:[#allocation2 + $0x390] sm:$0xff] }
  0x2e   :  { %878 = vmatpush1.bf16.msra.mxu1 %v877_v34  ;;  %v74_v4 = vld [vmem:[#allocation2 + $0xf8] sm:$0xff]  ;;  %v160_v8 = vld [vmem:[#allocation2 + $0x3a8] sm:$0xff]  ;;  %v71_v12 = vld [vmem:[#allocation2 + $0xe0] sm:$0xff]  ;;  %v977_v14 = vpack.c.bf16 %v157_v7, %v155_v6 }
  0x2f   :  { %954 = vmatpush1.bf16.msra.mxu0 %v953_v59  ;;  %880 = vmatprep.subr.bf16.mxu1 %v879_v35  ;;  %v156_v59 = vld [vmem:[#allocation2 + $0x388] sm:$0xff]  ;;  %v162_v9 = vld [vmem:[#allocation2 + $0x3b8] sm:$0xff]  ;;  %v891_v11 = vpack.c.bf16 %v74_v4, %v72_v3  ;;  %v159_v18 = vld [vmem:[#allocation2 + $0x3a0] sm:$0xff] }
  0x30   :  { %956 = vmatprep.subr.bf16.mxu0 %v955_v63  ;;  %v67_v63 = vld [vmem:[#allocation2 + $0xc0] sm:$0xff]  ;;  %v975_v5 = vpack.c.bf16 %v158_v60, %v156_v59  ;;  %v76_v15 = vld [vmem:[#allocation2 + $0x108] sm:$0xff]  ;;  %v979_v17 = vpack.c.bf16 %v162_v9, %v160_v8  ;;  %v161_v19 = vld [vmem:[#allocation2 + $0x3b0] sm:$0xff] }
  0x31   :  { %v889_v10 = vpack.c.bf16 %v69_v0, %v67_v63  ;;  %v164_v20 = vld [vmem:[#allocation2 + $0x3c8] sm:$0xff]  ;;  %v166_v21 = vld [vmem:[#allocation2 + $0x3d8] sm:$0xff]  ;;  %v75_v24 = vld [vmem:[#allocation2 + $0x100] sm:$0xff] }
  0x32   :  { %882 = vmatpush1.bf16.msra.mxu1 %v881_v47  ;;  %v77_v25 = vld [vmem:[#allocation2 + $0x110] sm:$0xff]  ;;  %v80_v27 = vld [vmem:[#allocation2 + $0x128] sm:$0xff]  ;;  %v82_v28 = vld [vmem:[#allocation2 + $0x138] sm:$0xff] }
  0x33   :  { %958 = vmatpush1.bf16.msra.mxu0 %v957_v13  ;;  %884 = vmatprep.subr.bf16.mxu1 %v883_v48  ;;  %v73_v13 = vld [vmem:[#allocation2 + $0xf0] sm:$0xff]  ;;  %v163_v30 = vld [vmem:[#allocation2 + $0x3c0] sm:$0xff]  ;;  %v168_v32 = vld [vmem:[#allocation2 + $0x3e8] sm:$0xff]  ;;  %v897_v34 = vpack.c.bf16 %v77_v25, %v75_v24  ;;  %v899_v35 = vpack.c.bf16 %v82_v28, %v80_v27 }
  0x34   :  { %960 = vmatprep.subr.bf16.mxu0 %v959_v16  ;;  %v78_v16 = vld [vmem:[#allocation2 + $0x118] sm:$0xff]  ;;  %v893_v22 = vpack.c.bf16 %v73_v13, %v71_v12  ;;  %v165_v31 = vld [vmem:[#allocation2 + $0x3d0] sm:$0xff]  ;;  %v79_v36 = vld [vmem:[#allocation2 + $0x120] sm:$0xff] }
  0x35   :  { %v895_v23 = vpack.c.bf16 %v78_v16, %v76_v15  ;;  %v170_v33 = vld [vmem:[#allocation2 + $0x3f8] sm:$0xff]  ;;  %v81_v37 = vld [vmem:[#allocation2 + $0x130] sm:$0xff]  ;;  %v84_v40 = vld [vmem:[#allocation2 + $0x148] sm:$0xff] }
  0x36   :  { %886 = vmatpush1.bf16.msra.mxu1 %v885_v61  ;;  %v86_v41 = vld [vmem:[#allocation2 + $0x158] sm:$0xff]  ;;  %v167_v43 = vld [vmem:[#allocation2 + $0x3e0] sm:$0xff]  ;;  %v169_v44 = vld [vmem:[#allocation2 + $0x3f0] sm:$0xff]  ;;  %v901_v47 = vpack.c.bf16 %v81_v37, %v79_v36 }
  0x37   :  { %962 = vmatpush1.bf16.msra.mxu0 %v961_v26  ;;  %888 = vmatprep.subr.bf16.mxu1 %v887_v62  ;;  %v981_v26 = vpack.c.bf16 %v161_v19, %v159_v18  ;;  %v172_v45 = vld [vmem:[#allocation2 + $0x408] sm:$0xff]  ;;  %v174_v46 = vld [vmem:[#allocation2 + $0x418] sm:$0xff]  ;;  %v903_v48 = vpack.c.bf16 %v86_v41, %v84_v40  ;;  %v83_v49 = vld [vmem:[#allocation2 + $0x140] sm:$0xff] }
  0x38   :  { %964 = vmatprep.subr.bf16.mxu0 %v963_v29  ;;  %v983_v29 = vpack.c.bf16 %v166_v21, %v164_v20  ;;  %v85_v51 = vld [vmem:[#allocation2 + $0x150] sm:$0xff]  ;;  %v88_v53 = vld [vmem:[#allocation2 + $0x168] sm:$0xff]  ;;  %v90_v54 = vld [vmem:[#allocation2 + $0x178] sm:$0xff] }
  0x39   :  { %v171_v56 = vld [vmem:[#allocation2 + $0x400] sm:$0xff]  ;;  %v173_v57 = vld [vmem:[#allocation2 + $0x410] sm:$0xff]  ;;  %v176_v59 = vld [vmem:[#allocation2 + $0x428] sm:$0xff]  ;;  %v905_v61 = vpack.c.bf16 %v85_v51, %v83_v49  ;;  %v907_v62 = vpack.c.bf16 %v90_v54, %v88_v53 }
  0x3a   :  { %890 = vmatpush1.bf16.msra.mxu1 %v889_v10  ;;  %v178_v60 = vld [vmem:[#allocation2 + $0x438] sm:$0xff]  ;;  %v87_v63 = vld [vmem:[#allocation2 + $0x160] sm:$0xff]  ;;  %v89_v0 = vld [vmem:[#allocation2 + $0x170] sm:$0xff] }
  0x3b   :  { %966 = vmatpush1.bf16.msra.mxu0 %v965_v39  ;;  %892 = vmatprep.subr.bf16.mxu1 %v891_v11  ;;  %v985_v39 = vpack.c.bf16 %v165_v31, %v163_v30  ;;  %v92_v3 = vld [vmem:[#allocation2 + $0x188] sm:$0xff]  ;;  %v94_v4 = vld [vmem:[#allocation2 + $0x198] sm:$0xff]  ;;  %v175_v6 = vld [vmem:[#allocation2 + $0x420] sm:$0xff]  ;;  %v909_v11 = vpack.c.bf16 %v89_v0, %v87_v63 }
  0x3c   :  { %968 = vmatprep.subr.bf16.mxu0 %v967_v42  ;;  %v987_v42 = vpack.c.bf16 %v170_v33, %v168_v32  ;;  %v177_v7 = vld [vmem:[#allocation2 + $0x430] sm:$0xff]  ;;  %v1250_v8 = vld [vmem:[%s1409_s0 + $0x8] sm:$0x3f]  ;;  %v182_v10 = vld [vmem:[#allocation2 + $0x458] sm:$0xff]  ;;  %v911_v13 = vpack.c.bf16 %v94_v4, %v92_v3 }
  0x3d   :  { %v180_v9 = vld [vmem:[#allocation2 + $0x448] sm:$0xff]  ;;  %v1254_v12 = vrot.slane %v1250_v8, %v1232_v50  ;;  %v93_v15 = vld [vmem:[#allocation2 + $0x190] sm:$0xff]  ;;  %v997_v16 = vpack.c.bf16 %v177_v7, %v175_v6  ;;  %v98_v18 = vld [vmem:[#allocation2 + $0x1b8] sm:$0xff] }
  0x3e   :  { %894 = vmatpush1.bf16.msra.mxu1 %v893_v22  ;;  %v999_v20 = vpack.c.bf16 %v182_v10, %v180_v9  ;;  %v179_v21 = vld [vmem:[#allocation2 + $0x440] sm:$0xff]  ;;  %v181_v22 = vld [vmem:[#allocation2 + $0x450] sm:$0xff]  ;;  %v186_v24 = vld [vmem:[#allocation2 + $0x478] sm:$0xff] }
  0x3f   :  { %970 = vmatpush1.bf16.msra.mxu0 %v969_v52  ;;  %896 = vmatprep.subr.bf16.mxu1 %v895_v23  ;;  %v989_v52 = vpack.c.bf16 %v169_v44, %v167_v43  ;;  %v285_v19 = vcombine.high %v1254_v12, %v1254_v12  ;;  %v184_v23 = vld [vmem:[#allocation2 + $0x468] sm:$0xff]  ;;  %v97_v27 = vld [vmem:[#allocation2 + $0x1b0] sm:$0xff]  ;;  %v1001_v28 = vpack.c.bf16 %v181_v22, %v179_v21  ;;  %v102_v30 = vld [vmem:[#allocation2 + $0x1d8] sm:$0xff] }
  0x40   :  { %972 = vmatprep.subr.bf16.mxu0 %v971_v55  ;;  %v991_v55 = vpack.c.bf16 %v174_v46, %v172_v45  ;;  %v1003_v31 = vpack.c.bf16 %v186_v24, %v184_v23  ;;  %v183_v32 = vld [vmem:[#allocation2 + $0x460] sm:$0xff]  ;;  %v185_v33 = vld [vmem:[#allocation2 + $0x470] sm:$0xff]  ;;  %v106_v43 = vld [vmem:[#allocation2 + $0x1f8] sm:$0xff] }
  0x41   :  { %v101_v40 = vld [vmem:[#allocation2 + $0x1d0] sm:$0xff]  ;;  %v1005_v41 = vpack.c.bf16 %v185_v33, %v183_v32  ;;  %v187_v45 = vld [vmem:[#allocation2 + $0x480] sm:$0xff]  ;;  %v598_v6 = vld [vmem:[%s1412_s3 + $0x88] sm:$0xff] }
  0x42   :  { %898 = vmatpush1.bf16.msra.mxu1 %v897_v34  ;;  %v188_v34 = vld [vmem:[#allocation2 + $0x488] sm:$0xff]  ;;  %v189_v46 = vld [vmem:[#allocation2 + $0x490] sm:$0xff]  ;;  %v195_v9 = vld [vmem:[#allocation2 + $0x4c0] sm:$0xff] }
  0x43   :  { %974 = vmatpush1.bf16.msra.mxu0 %v973_v2  ;;  %900 = vmatprep.subr.bf16.mxu1 %v899_v35  ;;  %v993_v2 = vpack.c.bf16 %v173_v57, %v171_v56  ;;  %v190_v35 = vld [vmem:[#allocation2 + $0x498] sm:$0xff]  ;;  %v105_v53 = vld [vmem:[#allocation2 + $0x1f0] sm:$0xff]  ;;  %v1009_v54 = vpack.c.bf16 %v189_v46, %v187_v45  ;;  %v199_v22 = vld [vmem:[#allocation2 + $0x4e0] sm:$0xff] }
  0x44   :  { %976 = vmatprep.subr.bf16.mxu0 %v975_v5  ;;  %v995_v5 = vpack.c.bf16 %v178_v60, %v176_v59  ;;  %v1007_v44 = vpack.c.bf16 %v190_v35, %v188_v34  ;;  %v238_v56 = vld [vmem:[#allocation2 + $0x618] sm:$0xff]  ;;  %v191_v59 = vld [vmem:[#allocation2 + $0x4a0] sm:$0xff]  ;;  %v193_v60 = vld [vmem:[#allocation2 + $0x4b0] sm:$0xff] }
  0x45   :  { %v237_v3 = vld [vmem:[#allocation2 + $0x610] sm:$0xff]  ;;  %v1013_v4 = vpack.c.bf16 %v193_v60, %v191_v59  ;;  %v203_v33 = vld [vmem:[#allocation2 + $0x500] sm:$0xff]  ;;  %v208_v35 = vld [vmem:[#allocation2 + $0x528] sm:$0xff] }
  0x46   :  { %902 = vmatpush1.bf16.msra.mxu1 %v901_v47  ;;  %v192_v47 = vld [vmem:[#allocation2 + $0x4a8] sm:$0xff]  ;;  %v197_v10 = vld [vmem:[#allocation2 + $0x4d0] sm:$0xff]  ;;  %v207_v46 = vld [vmem:[#allocation2 + $0x520] sm:$0xff] }
  0x47   :  { %978 = vmatpush1.bf16.msra.mxu0 %v977_v14  ;;  %904 = vmatprep.subr.bf16.mxu1 %v903_v48  ;;  %v91_v14 = vld [vmem:[#allocation2 + $0x180] sm:$0xff]  ;;  %v194_v48 = vld [vmem:[#allocation2 + $0x4b8] sm:$0xff]  ;;  %v201_v23 = vld [vmem:[#allocation2 + $0x4f0] sm:$0xff] }
  0x48   :  { %980 = vmatprep.subr.bf16.mxu0 %v979_v17  ;;  %v96_v17 = vld [vmem:[#allocation2 + $0x1a8] sm:$0xff]  ;;  %v913_v25 = vpack.c.bf16 %v93_v15, %v91_v14  ;;  %v1011_v57 = vpack.c.bf16 %v194_v48, %v192_v47  ;;  %v202_v14 = vld [vmem:[#allocation2 + $0x4f8] sm:$0xff]  ;;  %v205_v34 = vld [vmem:[#allocation2 + $0x510] sm:$0xff] }
  0x49   :  { %v209_v47 = vld [vmem:[#allocation2 + $0x530] sm:$0xff]  ;;  %v212_v48 = vld [vmem:[#allocation2 + $0x548] sm:$0xff]  ;;  %v211_v60 = vld [vmem:[#allocation2 + $0x540] sm:$0xff] }
  0x4a   :  { %906 = vmatpush1.bf16.msra.mxu1 %v905_v61  ;;  %v196_v61 = vld [vmem:[#allocation2 + $0x4c8] sm:$0xff] }
  0x4b   :  { %982 = vmatpush1.bf16.msra.mxu0 %v981_v26  ;;  %908 = vmatprep.subr.bf16.mxu1 %v907_v62  ;;  %v95_v26 = vld [vmem:[#allocation2 + $0x1a0] sm:$0xff]  ;;  %v198_v62 = vld [vmem:[#allocation2 + $0x4d8] sm:$0xff] }
  0x4c   :  { %984 = vmatprep.subr.bf16.mxu0 %v983_v29  ;;  %v100_v29 = vld [vmem:[#allocation2 + $0x1c8] sm:$0xff]  ;;  %v917_v36 = vpack.c.bf16 %v97_v27, %v95_v26  ;;  %v1015_v7 = vpack.c.bf16 %v198_v62, %v196_v61  ;;  %v1173_v26 = vmov 0.0   ;;  %v213_v61 = vld [vmem:[#allocation2 + $0x550] sm:$0xff] }
  0x4d   :  { %v919_v37 = vpack.c.bf16 %v102_v30, %v100_v29  ;;  %v583_v29 = vld [vmem:[%s1412_s3 + $0x10] sm:$0xff]  ;;  %v601_v30 = vld [vmem:[%s1412_s3 + $0xa0] sm:$0xff]  ;;  %v216_v62 = vld [vmem:[#allocation2 + $0x568] sm:$0xff] }
  0x4e   :  { %910 = vmatpush1.bf16.msra.mxu1 %v909_v11  ;;  %v270_v11 = vcombine.high %v1250_v8, %v1250_v8  ;;  %v599_v8 = vld [vmem:[%s1412_s3 + $0x90] sm:$0xff] }
  0x4f   :  { %986 = vmatpush1.bf16.msra.mxu0 %v985_v39  ;;  %912 = vmatprep.subr.bf16.mxu1 %v911_v13  ;;  %v99_v39 = vld [vmem:[#allocation2 + $0x1c0] sm:$0xff]  ;;  %v200_v13 = vld [vmem:[#allocation2 + $0x4e8] sm:$0xff] }
  0x50   :  { %988 = vmatprep.subr.bf16.mxu0 %v987_v42  ;;  %v104_v42 = vld [vmem:[#allocation2 + $0x1e8] sm:$0xff]  ;;  %v921_v49 = vpack.c.bf16 %v101_v40, %v99_v39  ;;  %v1019_v21 = vpack.c.bf16 %v202_v14, %v200_v13  ;;  %v284_v24 = vrot.slane %v270_v11, %v1232_v50  ;;  %v1021_v50 = vpack.c.bf16 %v201_v23, %v199_v22  ;;  %v585_v40 = vld [vmem:[%s1412_s3 + $0x20] sm:$0xff]  ;;  %v222_v11 = vld [vmem:[#allocation2 + $0x598] sm:$0xff] }
  0x51   :  { %v923_v51 = vpack.c.bf16 %v106_v43, %v104_v42  ;;  %v1025_v42 = vpack.c.bf16 %v205_v34, %v203_v33  ;;  %v603_v43 = vld [vmem:[%s1412_s3 + $0xb0] sm:$0xff]  ;;  %v228_v23 = vld [vmem:[#allocation2 + $0x5c8] sm:$0xff] }
  0x52   :  { %914 = vmatpush1.bf16.msra.mxu1 %v913_v25  ;;  %v204_v25 = vld [vmem:[#allocation2 + $0x508] sm:$0xff]  ;;  %v225_v22 = vld [vmem:[#allocation2 + $0x5b0] sm:$0xff] }
  0x53   :  { %990 = vmatpush1.bf16.msra.mxu0 %v989_v52  ;;  %v103_v52 = vld [vmem:[#allocation2 + $0x1e0] sm:$0xff]  ;;  %v607_v34 = vld [vmem:[%s1412_s3 + $0xd0] sm:$0xff] }
  0x54   :  { %992 = vmatprep.subr.bf16.mxu0 %v991_v55  ;;  %v236_v55 = vld [vmem:[#allocation2 + $0x608] sm:$0xff]  ;;  %v925_v63 = vpack.c.bf16 %v105_v53, %v103_v52  ;;  %v587_v53 = vld [vmem:[%s1412_s3 + $0x30] sm:$0xff] }
  0x55   :  { %v1055_v0 = vpack.c.bf16 %v238_v56, %v236_v55  ;;  %v1029_v55 = vpack.c.bf16 %v209_v47, %v207_v46  ;;  %v605_v56 = vld [vmem:[%s1412_s3 + $0xc0] sm:$0xff]  ;;  %v611_v46 = vld [vmem:[%s1412_s3 + $0xf0] sm:$0xff]  ;;  %v612_v47 = vld [vmem:[%s1412_s3 + $0xf8] sm:$0xff] }
  0x56   :  { %431 = vmatmul.mubr.f32.vlgmr.msra.gmra.mrb[0].mxu0 %v1241_v1  ;;  %v915_v1 = vpack.c.bf16 %v98_v18, %v96_v17  ;;  %v581_v17 = vld [vmem:[%s1412_s3] sm:$0xff]  ;;  %v582_v18 = vld [vmem:[%s1412_s3 + $0x8] sm:$0xff] }
  0x57   :  { %994 = vmatpush1.bf16.msra.mxu0 %v993_v2  ;;  %501 = vmatprep.mubr.f32.mxu0 %v285_v19  ;;  %v235_v2 = vld [vmem:[#allocation2 + $0x600] sm:$0xff]  ;;  %v1017_v19 = vpack.c.bf16 %v197_v10, %v195_v9  ;;  %v1061_v27 = vpack.c.bf16 %v582_v18, %v581_v17  ;;  %v217_v9 = vld [vmem:[#allocation2 + $0x570] sm:$0xff]  ;;  %v220_v10 = vld [vmem:[#allocation2 + $0x588] sm:$0xff] }
  0x58   :  { %996 = vmatprep.subr.bf16.mxu0 %v995_v5  ;;  %916 = vmatprep.subr.bf16.mxu1 %v915_v1  ;;  %v597_v5 = vld [vmem:[%s1412_s3 + $0x80] sm:$0xff]  ;;  %v1057_v15 = vpack.c.bf16 %v237_v3, %v235_v2  ;;  %v206_v1 = vld [vmem:[#allocation2 + $0x518] sm:$0xff]  ;;  %v221_v17 = vld [vmem:[#allocation2 + $0x590] sm:$0xff] }
  0x59   :  { %918 = vmatpush1.bf16.msra.mxu1 %v917_v36  ;;  %v1023_v32 = vpack.c.bf16 %v206_v1, %v204_v25  ;;  %v210_v36 = vld [vmem:[#allocation2 + $0x538] sm:$0xff]  ;;  %v589_v3 = vld [vmem:[%s1412_s3 + $0x40] sm:$0xff]  ;;  %v224_v18 = vld [vmem:[#allocation2 + $0x5a8] sm:$0xff] }
  0x5a   :  { %920 = vmatprep.subr.bf16.mxu1 %v919_v37  ;;  %v1027_v45 = vpack.c.bf16 %v210_v36, %v208_v35  ;;  %v608_v35 = vld [vmem:[%s1412_s3 + $0xd8] sm:$0xff] }
  0x5b   :  { %998 = vmatpush1.bf16.msra.mxu0 %v997_v16  ;;  %v1059_v16 = vpack.c.bf16 %v598_v6, %v597_v5  ;;  %v1033_v5 = vpack.c.bf16 %v213_v61, %v211_v60  ;;  %v1079_v36 = vpack.c.bf16 %v608_v35, %v607_v34  ;;  %v239_v60 = vld [vmem:[%s1411_s2] sm:$0x3]  ;;  %v247_v61 = vsub.s32 1, %v1229_v38 }
  0x5c   :  { %1000 = vmatprep.subr.bf16.mxu0 %v999_v20  ;;  %v600_v20 = vld [vmem:[%s1412_s3 + $0x98] sm:$0xff] }
  0x5d   :  { %922 = vmatpush1.bf16.msra.mxu1 %v921_v49  ;;  %v214_v49 = vld [vmem:[#allocation2 + $0x558] sm:$0xff] }
  0x5e   :  { %924 = vmatprep.subr.bf16.mxu1 %v923_v51  ;;  %v1031_v59 = vpack.c.bf16 %v214_v49, %v212_v48  ;;  %v1087_v48 = vpack.c.bf16 %v612_v47, %v611_v46  ;;  %v595_v49 = vld [vmem:[%s1412_s3 + $0x70] sm:$0xff] }
  0x5f   :  { %1002 = vmatpush1.bf16.msra.mxu0 %v1001_v28  ;;  %v1063_v28 = vpack.c.bf16 %v600_v20, %v599_v8 }
  0x60   :  { %1004 = vmatprep.subr.bf16.mxu0 %v1003_v31  ;;  %v602_v31 = vld [vmem:[%s1412_s3 + $0xa8] sm:$0xff] }
  0x61   :  { %926 = vmatpush1.bf16.msra.mxu1 %v925_v63  ;;  %v1067_v39 = vpack.c.bf16 %v602_v31, %v601_v30  ;;  %v218_v63 = vld [vmem:[#allocation2 + $0x578] sm:$0xff]  ;;  %v231_v31 = vld [vmem:[#allocation2 + $0x5e0] sm:$0xff] }
  0x62   :  { %1056 = vmatprep.subr.bf16.mxu1 %v1055_v0  ;;  %v1035_v6 = vpack.c.bf16 %v218_v63, %v216_v62  ;;  %v248_v63 = vrot.slane %v239_v60, %v247_v61 }
  0x63   :  { %1006 = vmatpush1.bf16.msra.mxu0 %v1005_v41  ;;  %v586_v41 = vld [vmem:[%s1412_s3 + $0x28] sm:$0xff] }
  0x64   :  { %1008 = vmatprep.subr.bf16.mxu0 %v1007_v44  ;;  %360 = vmatmul.mubr.f32.vlgmr.msra.gmra.mrb[0].mxu1 %v1238_v58  ;;  %v584_v58 = vld [vmem:[%s1412_s3 + $0x18] sm:$0xff]  ;;  %v1069_v51 = vpack.c.bf16 %v586_v41, %v585_v40  ;;  %v610_v41 = vld [vmem:[%s1412_s3 + $0xe8] sm:$0xff] }
  0x65   :  { %1058 = vmatpush1.bf16.msra.mxu1 %v1057_v15  ;;  %572 = vmatprep.mubr.f32.mxu1 %v1173_v26  ;;  %v1065_v37 = vpack.c.bf16 %v584_v58, %v583_v29  ;;  %v604_v44 = vld [vmem:[%s1412_s3 + $0xb8] sm:$0xff]  ;;  %v1039_v15 = vpack.c.bf16 %v222_v11, %v220_v10  ;;  %v232_v29 = vld [vmem:[#allocation2 + $0x5e8] sm:$0xff] }
  0x66   :  { %1060 = vmatprep.subr.bf16.mxu1 %v1059_v16  ;;  %v1071_v52 = vpack.c.bf16 %v604_v44, %v603_v43  ;;  %v219_v16 = vld [vmem:[#allocation2 + $0x580] sm:$0xff]  ;;  %v234_v58 = vld [vmem:[#allocation2 + $0x5f8] sm:$0xff]  ;;  %v594_v44 = vld [vmem:[%s1412_s3 + $0x68] sm:$0xff] }
  0x67   :  { %1010 = vmatpush1.bf16.msra.mxu0 %v1009_v54  ;;  %v588_v54 = vld [vmem:[%s1412_s3 + $0x38] sm:$0xff]  ;;  %v1041_v8 = vpack.c.bf16 %v221_v17, %v219_v16  ;;  %v1051_v30 = vpack.c.bf16 %v234_v58, %v232_v29  ;;  %v593_v43 = vld [vmem:[%s1412_s3 + $0x60] sm:$0xff]  ;;  %v692_v10 = vld [vmem:[%s1414_s5 + $0x8] sm:$0xff] }
  0x68   :  { %1012 = vmatprep.subr.bf16.mxu0 %v1011_v57  ;;  %796 = vmatmul.mubr.msk.f32.vlgmr.msra.gmra.mrb[2].mxu1 %vm292_vm0, %v284_v24  ;;  %v606_v57 = vld [vmem:[%s1412_s3 + $0xc8] sm:$0xff]  ;;  %v1073_v0 = vpack.c.bf16 %v588_v54, %v587_v53  ;;  %v230_v24 = vld [vmem:[#allocation2 + $0x5d8] sm:$0xff]  ;;  %v1174_v53 = vmov 0.0|0.0   ;;  %v798_v29 = vld [vmem:[%s1415_s6] ss:$0 sm:$0xff] }
  0x69   :  { %1062 = vmatpush3.bf16.msra.mxu1 %v1061_v27  ;;  %v1075_v2 = vpack.c.bf16 %v606_v57, %v605_v56  ;;  %v1047_v1 = vpack.c.bf16 %v230_v24, %v228_v23  ;;  %v227_v27 = vld [vmem:[#allocation2 + $0x5c0] sm:$0xff]  ;;  %v694_v16 = vld [vmem:[%s1414_s5 + $0x18] sm:$0xff] }
  0x6a   :  { %1064 = vmatprep.subr.bf16.mxu1 %v1063_v28  ;;  %v229_v28 = vld [vmem:[#allocation2 + $0x5d0] sm:$0xff]  ;;  %v797_v24 = vld [vmem:[%s1413_s4] ss:$0 sm:$0xff] }
  0x6b   :  { %1014 = vmatpush1.bf16.msra.mxu0 %v1013_v4  ;;  %v590_v4 = vld [vmem:[%s1412_s3 + $0x48] sm:$0xff] }
  0x6c   :  { %1016 = vmatprep.subr.bf16.mxu0 %v1015_v7  ;;  %v215_v7 = vld [vmem:[#allocation2 + $0x560] sm:$0xff]  ;;  %v1077_v13 = vpack.c.bf16 %v590_v4, %v589_v3 }
  0x6d   :  { %1066 = vmatpush3.bf16.msra.mxu1 %v1065_v37  ;;  %v1037_v14 = vpack.c.bf16 %v217_v9, %v215_v7  ;;  %v591_v37 = vld [vmem:[%s1412_s3 + $0x50] sm:$0xff]  ;;  %v691_v9 = vld [vmem:[%s1414_s5] sm:$0xff] }
  0x6e   :  { %1068 = vmatprep.subr.bf16.mxu1 %v1067_v39  ;;  %v592_v39 = vld [vmem:[%s1412_s3 + $0x58] sm:$0xff] }
  0x6f   :  { %1018 = vmatpush1.bf16.msra.mxu0 %v1017_v19  ;;  %v226_v19 = vld [vmem:[#allocation2 + $0x5b8] sm:$0xff]  ;;  %v1081_v40 = vpack.c.bf16 %v592_v39, %v591_v37 }
  0x70   :  { %1020 = vmatprep.subr.bf16.mxu0 %v1019_v21  ;;  %v1043_v20 = vpack.c.bf16 %v226_v19, %v224_v18  ;;  %v223_v21 = vld [vmem:[#allocation2 + $0x5a0] sm:$0xff]  ;;  %v696_v19 = vld [vmem:[%s1414_s5 + $0x28] sm:$0xff] }
  0x71   :  { %1070 = vmatpush3.bf16.msra.mxu1 %v1069_v51  ;;  %v1045_v25 = vpack.c.bf16 %v225_v22, %v223_v21  ;;  %v596_v51 = vld [vmem:[%s1412_s3 + $0x78] sm:$0xff]  ;;  %v695_v18 = vld [vmem:[%s1414_s5 + $0x20] sm:$0xff] }
  0x72   :  { %1072 = vmatprep.subr.bf16.mxu1 %v1071_v52  ;;  %v1089_v52 = vpack.c.bf16 %v596_v51, %v595_v49  ;;  %v698_v21 = vld [vmem:[%s1414_s5 + $0x38] sm:$0xff] }
  0x73   :  { %1022 = vmatpush1.bf16.msra.mxu0 %v1021_v50  ;;  %v1049_v50 = vpack.c.bf16 %v229_v28, %v227_v27 }
  0x74   :  { %1024 = vmatprep.subr.bf16.mxu0 %v1023_v32  ;;  %v233_v32 = vld [vmem:[#allocation2 + $0x5f0] sm:$0xff] }
  0x75   :  { %1074 = vmatpush3.bf16.msra.mxu1 %v1073_v0  ;;  %v1053_v33 = vpack.c.bf16 %v233_v32, %v231_v31 }
  0x76   :  { %1076 = vmatprep.subr.bf16.mxu1 %v1075_v2 }
  0x77   :  { %1026 = vmatpush1.bf16.msra.mxu0 %v1025_v42 }
  0x78   :  { %1028 = vmatprep.subr.bf16.mxu0 %v1027_v45  ;;  %v1085_v45 = vpack.c.bf16 %v594_v44, %v593_v43 }
  0x79   :  { %1078 = vmatpush3.bf16.msra.mxu1 %v1077_v13 }
  0x7a   :  { %1080 = vmatprep.subr.bf16.mxu1 %v1079_v36 }
  0x7b   :  { %1030 = vmatpush1.bf16.msra.mxu0 %v1029_v55 }
  0x7c   :  { %1032 = vmatprep.subr.bf16.mxu0 %v1031_v59  ;;  %v243_v59 = vsub.s32 0, %v1229_v38  ;;  %v1092_v38 = vpack.c.bf16 %v692_v10, %v691_v9 }
  0x7d   :  { %1082 = vmatpush3.bf16.msra.mxu1 %v1081_v40 }
  0x7e   :  { %v244_v62 = vrot.slane %v239_v60, %v243_v59 }
  0x7f   :  { %1034 = vmatpush1.bf16.msra.mxu0 %v1033_v5 }
  0x80   :  { %1036 = vmatprep.subr.bf16.mxu0 %v1035_v6 }
  0x83   :  { %1038 = vmatpush1.bf16.msra.mxu0 %v1037_v14 }
  0x84   :  { %1040 = vmatprep.subr.bf16.mxu0 %v1039_v15  ;;  %v693_v15 = vld [vmem:[%s1414_s5 + $0x10] sm:$0xff] }
  0x85   :  { %v1095_v17 = vpack.c.bf16 %v694_v16, %v693_v15 }
  0x87   :  { %1042 = vmatpush1.bf16.msra.mxu0 %v1041_v8  ;;  %v1098_v8 = vpack.c.bf16 %v696_v19, %v695_v18 }
  0x88   :  { %1044 = vmatprep.subr.bf16.mxu0 %v1043_v20  ;;  %v697_v20 = vld [vmem:[%s1414_s5 + $0x30] sm:$0xff]  ;;  %s1176_s5 = smov [#allocation5]  }
  0x89   :  { %v1101_v22 = vpack.c.bf16 %v698_v21, %v697_v20  ;;  %s787_s26 = sshll.u32 %s1176_s5, 4  ;;  %s788_s26 = int_to_ptr.vmem [resolvable:$true] %s787_s26 }
  0x8a   :  { %s1143_s27 = scalar_lea.vmem %s788_s26, 32  ;;  %p1148_p9 = scmp.lt.s32.totalorder %s788_s26, %s788_s26 }
  0x8b   :  { %1046 = vmatpush1.bf16.msra.mxu0 %v1045_v25  ;;  %p1144_p8 = scmp.ne.s32.totalorder %s788_s26, %s1143_s27  ;;  %p1149_p10 = scmp.lt.s32.totalorder %s1143_s27, %s1143_s27 }
  0x8c   :  { %1048 = vmatprep.subr.bf16.mxu0 %v1047_v1 }
  0x8d   :  { %p1150_p11 = por %p1149_p10, %p1148_p9 }
  0x8f   :  { %1050 = vmatpush1.bf16.msra.mxu0 %v1049_v50  ;;  %p1151_p12 = pnand %p1150_p11, %p1144_p8 }
  0x90   :  { %1052 = vmatprep.subr.bf16.mxu0 %v1051_v30 }
  0x93   :  { %1054 = vmatpush1.bf16.msra.mxu0 %v1053_v33 }
  0x96   :  { %502 = vmatmul.mubr.f32.vlgmr.msra.gmra.mrb[0].mxu0 %v1254_v12  ;;  %v609_v12 = vld [vmem:[%s1412_s3 + $0xe0] sm:$0xff] }
  0x97   :  { %v1083_v42 = vpack.c.bf16 %v610_v41, %v609_v12 }
  0x99   :  { %1084 = vmatprep.subr.bf16.mxu1 %v1083_v42 }
  0x9a   :  { %1086 = vmatpush3.bf16.msra.mxu1 %v1085_v45 }
  0x9b   :  { %1088 = vmatprep.subr.bf16.mxu1 %v1087_v48 }
  0x9e   :  { %1090 = vmatpush3.bf16.msra.mxu1 %v1089_v52 }
  0x9f   :  { %1091 = vmatprep.subr.bf16.mxu1 %v1174_v53 }
 0x137   :  { %v361_v54 = vpop.f32.mrb[0].mxu1 }
 0x138   :  { %v363_v55 = vpop.f32.mrb[1].mxu1  ;;  %v362_v0 = vadd.f32 %v361_v54, %v244_v62 }
 0x139   :  { %v364_v2 = vadd.f32 %v363_v55, %v248_v63 }
 0x13b   :  { %v574_v56 = vpop.f32.mrb[2].mxu1 }
 0x13c   :  { %v576_v57 = vpop.f32.mrb[3].mxu1 }
 0x169   :  { %v503_v3 = vpop.f32.mrb[0].mxu0 }
 0x16a   :  { %v1104_v4 = vadd.f32 %v503_v3, %v362_v0  ;;  %v505_v5 = vpop.f32.mrb[1].mxu0 }
 0x16b   :  { %v1107_v6 = vadd.f32 %v505_v5, %v364_v2 }
 0x16c   :  { %v1105_v7 = vadd.f32 %v1104_v4, %v574_v56 }
 0x16d   :  { %v1108_v11 = vadd.f32 %v1107_v6, %v576_v57 }
 0x16e   :  { %v579_v14 = vmax.f32 %v1105_v7, 0.0 }
 0x16f   :  { %v580_v13 = vmax.f32 %v1108_v11, 0.0 }
 0x171   :  { %684 = vmatprep.mubr.f32.mxu1 %v580_v13 }
 0x172   :  { %685 = vmatmul.mubr.f32.vlgmr.msra.gmra.mrb[4].mxu1 %v579_v14 }
 0x173   :  { %1093 = vmatpush3.bf16.msra.mxu1 %v1092_v38  ;;  %860 = vmatprep.mubr.msk.f32.mxu1 %vm1175_vm1, %v1173_v26 }
 0x174   :  { %1094 = vmatprep.subr.bf16.mxu1 %v1174_v53 }
 0x177   :  { %1096 = vmatpush3.bf16.msra.mxu1 %v1095_v17 }
 0x178   :  { %1097 = vmatprep.subr.bf16.mxu1 %v1174_v53 }
 0x17b   :  { %1099 = vmatpush3.bf16.msra.mxu1 %v1098_v8 }
 0x17c   :  { %1100 = vmatprep.subr.bf16.mxu1 %v1174_v53 }
 0x17f   :  { %1102 = vmatpush3.bf16.msra.mxu1 %v1101_v22 }
 0x245   :  { %v832_v23 = vpop.f32.mrb[4].mxu1 }
 0x246   :  { %v833_v25 = vpop.f32.mrb[5].mxu1 }
 0x247   :  { %v834_v1 = vadd.f32 %v833_v25, %v832_v23 }
 0x249   :  { %v687_v27 = vadd.f32 %v834_v1, %v797_v24 }
 0x24b   :  { %v690_v28 = vmax.f32 %v687_v27, 0.0 }
 0x24d   :  { %861 = vmatmul.mubr.msk.f32.vlgmr.msra.gmra.mrb[6].mxu1 %vm706_vm2, %v690_v28 }
 0x320   :  { %v776_v58 = vpop.f32.mrb[6].mxu1 }
 0x321   :  { %v777_v50 = vadd.f32 %v798_v29, %v776_v58  ;;  %v862_v26 = vpop.f32.mrb[7].mxu1 }
 0x323   :  { %780 = vst [vmem:[#allocation5] sm:$0x3] %v777_v50 }
 0x324   :  { %1154 = shalt.err (!%p1151_p12)
}
 0x325   :  { %s1155_s29 = scalar_lea.hbm %s1416_s7, 32 }
 0x326   :  { %p1156_p13 = scmp.ne.s32.totalorder %s1416_s7, %s1155_s29  ;;  %p1159_p0 = scmp.lt.u32.totalorder %s1155_s29, %s1416_s7 }
 0x328   :  { %p1161_p1 = pnand %p1159_p0, %p1156_p13 }
 0x32a   :  { %1164 = shalt.err (!%p1161_p1)
}
 0x32b   :  { %790 = dma.vmem_to_hbm [thread:$0]  %s788_s26, 32, %s1416_s7, [#allocation4]  }
 0x32c   :  { %1167 = dma.done.wait [#allocation4], 32  }
 0x32d   :  { %1168 = vsyncadd [#allocation4], 4294967264 }
 0x32e   :  { %794 = vsyncpa [#allocation3], 1 }
 0x32f   :  { %795 = vsyncpa [#allocation4], 1 }

</bundles_post_ra>
